<compile_context>
chip_gen: v6e
topology: v6e:2x2x1
jax: 0.10.0
libtpu: 0.0.40
codegen_flags: <defaults>
</compile_context>

<pallas_src>
import functools

import numpy as np
import jax
import jax.numpy as jnp
from jax.experimental import pallas as pl
from jax.experimental.pallas import tpu as pltpu


_SUBLANE = 16   # bf16 sublane-packing granularity (rows)
_LANE = 128     # lane width


def _round_up(x, m):
    return ((x + m - 1) // m) * m


# ---------------------------------------------------------------------------
# Parameter packing: [w0, b0, w1, b1, ..., wL, bL]  ->  one bf16 2-D buffer.
#   * layer i weight lives at rows w_row_i : w_row_i + in_rows_i,
#     lanes 0:out_pad_i (stored (in, out), i.e. transposed vs. PyTorch).
#     in_rows_0 = latent; for i>0, in_rows_i = out_pad_{i-1} (padded width of
#     the previous activation).  Padded rows/lanes are zero.
#   * layer i bias lives in row b_row_i, lanes 0:out_dim_i (rest zero).
# All weight blocks start on 16-row boundaries; lane width is 128-aligned, so
# every in-kernel slice is a full, unmasked bf16 tile.
# ---------------------------------------------------------------------------
def pack_decoder_params(params):
    ws = params[0::2]
    bs = params[1::2]
    n_layers = len(ws)
    lanes = _round_up(max(w.shape[1] for w in ws), _LANE)

    in_rows, out_pads = [], []
    prev_out_pad = None
    for i, w in enumerate(ws):
        in_dim, out_dim = w.shape
        in_rows.append(in_dim if i == 0 else prev_out_pad)
        prev_out_pad = _round_up(out_dim, _LANE)
        out_pads.append(prev_out_pad)

    w_rows, row = [], 0
    for rows in in_rows:
        w_rows.append(row)
        row += _round_up(rows, _SUBLANE)
    bias_row0 = row
    total_rows = _round_up(bias_row0 + n_layers, _SUBLANE)

    buf = np.zeros((total_rows, lanes), np.float32)
    layer_specs = []
    for i, (w, b) in enumerate(zip(ws, bs)):
        in_dim, out_dim = w.shape
        r = w_rows[i]
        buf[r:r + in_dim, :out_dim] = np.asarray(w, np.float32)
        buf[bias_row0 + i, :out_dim] = np.asarray(b, np.float32).reshape(-1)
        layer_specs.append((r, in_rows[i], out_pads[i], bias_row0 + i, out_dim))
    return jnp.asarray(buf, dtype=jnp.bfloat16), tuple(layer_specs)


# ---------------------------------------------------------------------------
# Kernel: whole decoder forward for one batch tile.
# ---------------------------------------------------------------------------
def decoder_kernel(x_ref, p_ref, out_ref, *, layer_specs):
    """layer_specs: tuple of (w_row, in_rows, out_pad, b_row, out_dim); the
    last entry is the output layer (sigmoid), earlier ones are LeakyReLU(0.2)."""
    h = x_ref[...].astype(jnp.bfloat16)
    n_layers = len(layer_specs)
    for li, (w_row, in_rows, out_pad, b_row, out_dim) in enumerate(layer_specs):
        w = p_ref[w_row:w_row + in_rows, 0:out_pad]                  # bf16 tile
        b = p_ref[b_row:b_row + 1, 0:out_pad].astype(jnp.float32)    # (1, out_pad)
        y = jnp.dot(h, w, preferred_element_type=jnp.float32) + b    # MXU, f32 acc
        if li < n_layers - 1:
            # LeakyReLU(0.2): single mul + max on the VPU (padded cols stay 0).
            h = jnp.maximum(y, 0.2 * y).astype(jnp.bfloat16)
        else:
            # sigmoid(y) = 1 / (1 + exp(-y)); exp + approx reciprocal -> EUP.
            s = pl.reciprocal(1.0 + jnp.exp(-y), approx=True)
            out_ref[...] = s[:, :out_dim]


def decoder_forward(x, packed_params, layer_specs, *, block_b=256):
    """x: (B, latent) f32.  Returns sigmoid outputs, (B, out_dim) f32."""
    batch, latent = x.shape
    out_dim = layer_specs[-1][4]

    tb = min(block_b, _round_up(batch, 8))
    padded = _round_up(batch, tb)
    if padded != batch:
        x = jnp.pad(x, ((0, padded - batch), (0, 0)))
    grid = (padded // tb,)

    out = pl.pallas_call(
        functools.partial(decoder_kernel, layer_specs=layer_specs),
        out_shape=jax.ShapeDtypeStruct((padded, out_dim), jnp.float32),
        grid=grid,
        in_specs=[
            pl.BlockSpec((tb, latent), lambda i: (i, 0)),
            pl.BlockSpec(packed_params.shape, lambda i: (0, 0)),  # resident
        ],
        out_specs=pl.BlockSpec((tb, out_dim), lambda i: (i, 0)),
        compiler_params=pltpu.CompilerParams(
            dimension_semantics=("parallel",)),
    )(x, packed_params)
    return out[:batch]


# ---------------------------------------------------------------------------
# Init (mimics nn.Linear default: uniform +-1/sqrt(fan_in)) and references.
# ---------------------------------------------------------------------------
def init_decoder_params(key, dimensions_latent, dimensions_hidden,
                        output_dimensions, img_size):
    num_hidden_layers = 3 if img_size == 32 else 4
    dims = [dimensions_latent] + [dimensions_hidden] * num_hidden_layers
    layer_shapes = list(zip(dims[:-1], dims[1:])) + [
        (dimensions_hidden, output_dimensions)]
    params = []
    for (fan_in, fan_out) in layer_shapes:
        key, kw, kb = jax.random.split(key, 3)
        bound = float(1.0 / np.sqrt(fan_in))
        w = jax.random.uniform(kw, (fan_in, fan_out), jnp.float32, -bound, bound)
        b = jax.random.uniform(kb, (1, fan_out), jnp.float32, -bound, bound)
        params += [w, b]
    return params, num_hidden_layers


def _leaky_relu(v, slope=0.2):
    return jnp.maximum(v, slope * v)


def decoder_reference_f32(x, params, *, num_hidden_layers):
    h = x
    for li in range(num_hidden_layers):
        h = _leaky_relu(h @ params[2 * li] + params[2 * li + 1])
    logits = h @ params[2 * num_hidden_layers] + params[2 * num_hidden_layers + 1]
    return jax.nn.sigmoid(logits)


def decoder_reference_bf16(x, params, *, num_hidden_layers):
    """Pure-JAX reference with the same bf16 quantization as the kernel."""
    h = x.astype(jnp.bfloat16)
    n = num_hidden_layers + 1
    for li in range(n):
        w = params[2 * li].astype(jnp.bfloat16)
        b = params[2 * li + 1].astype(jnp.bfloat16).astype(jnp.float32)
        y = jnp.dot(h, w, preferred_element_type=jnp.float32) + b
        if li < n - 1:
            h = _leaky_relu(y).astype(jnp.bfloat16)
        else:
            return jax.nn.sigmoid(y)


if __name__ == "__main__":
    # Decoder(dimensions_latent=16, dimensions_hidden=32,
    #         output_dimensions=IMG_SIZE*IMG_SIZE, IMG_SIZE=16)
    # IMG_SIZE != 32  =>  fourth hidden layer present (4 hidden layers).
    BATCH = 8
    LATENT = 16
    HIDDEN = 32
    IMG_SIZE = 16
    OUTPUT = IMG_SIZE * IMG_SIZE  # 256

    key = jax.random.PRNGKey(0)
    key, kx = jax.random.split(key)
    x = jax.random.normal(kx, (BATCH, LATENT), jnp.float32)

    params, num_hidden_layers = init_decoder_params(
        key, LATENT, HIDDEN, OUTPUT, IMG_SIZE)
    packed, layer_specs = pack_decoder_params(params)
    assert len(layer_specs) == num_hidden_layers + 1

    out = decoder_forward(x, packed, layer_specs)
    out = jax.block_until_ready(out)

    ref16 = decoder_reference_bf16(x, params, num_hidden_layers=num_hidden_layers)
    ref32 = decoder_reference_f32(x, params, num_hidden_layers=num_hidden_layers)

    assert out.shape == (BATCH, OUTPUT), out.shape
    assert bool(jnp.all(jnp.isfinite(out)))
    # Tight check vs. the identically-quantized reference...
    assert jnp.allclose(out, ref16, atol=1e-2), \
        float(jnp.max(jnp.abs(out - ref16)))
    # ...and a looser check vs. the exact f32 (PyTorch-semantics) reference.
    assert jnp.allclose(out, ref32, atol=2e-2), \
        float(jnp.max(jnp.abs(out - ref32)))

    print("KERNEL_OK")
</pallas_src>

<mosaic_0001>
module attributes {stable_mosaic.version = 11 : i64} {
  func.func @decoder_kernel(%arg0: i32, %arg1: memref<8x16xf32, #tpu.memory_space<vmem>>, %arg2: memref<544x256xbf16, #tpu.memory_space<vmem>>, %arg3: memref<8x256xf32, #tpu.memory_space<vmem>>) attributes {dimension_semantics = [#tpu.dimension_semantics<parallel>], iteration_bounds = array<i64: 1>, scalar_prefetch = 0 : i64, scratch_operands = 0 : i64, tpu.core_type = #tpu.core_type<tc>, window_params = [{transform_indices = @transform_0, window_bounds = array<i64: 8, 16>}, {pipeline_mode = #tpu.pipeline_mode<synchronous>, transform_indices = @transform_1, window_bounds = array<i64: 544, 256>}, {transform_indices = @transform_2, window_bounds = array<i64: 8, 256>}]} {
    %c0 = arith.constant 0 : index
    %c0_0 = arith.constant 0 : index
    %0 = vector.load %arg1[%c0, %c0_0] : memref<8x16xf32, #tpu.memory_space<vmem>>, vector<8x16xf32>
    %1 = arith.truncf %0 : vector<8x16xf32> to vector<8x16xbf16>
    %c0_1 = arith.constant 0 : index
    %c0_2 = arith.constant 0 : index
    %2 = vector.load %arg2[%c0_1, %c0_2] : memref<544x256xbf16, #tpu.memory_space<vmem>>, vector<16x128xbf16>
    %c528 = arith.constant 528 : index
    %c0_3 = arith.constant 0 : index
    %3 = vector.load %arg2[%c528, %c0_3] : memref<544x256xbf16, #tpu.memory_space<vmem>>, vector<1x128xbf16>
    %4 = arith.extf %3 : vector<1x128xbf16> to vector<1x128xf32>
    %cst = arith.constant dense<0.000000e+00> : vector<8x128xf32>
    %5 = tpu.matmul %1, %2, %cst {dimension_numbers = #tpu.dot_dimension_numbers<[1], [0], [0], [1], [0, 0, 1, 1], [], []>} : vector<8x16xbf16>, vector<16x128xbf16>, vector<8x128xf32> -> vector<8x128xf32>
    %6 = vector.broadcast %4 : vector<1x128xf32> to vector<8x128xf32>
    %7 = arith.addf %5, %6 : vector<8x128xf32>
    %cst_4 = arith.constant 2.000000e-01 : f32
    %8 = vector.broadcast %cst_4 : f32 to vector<8x128xf32>
    %9 = arith.mulf %8, %7 : vector<8x128xf32>
    %10 = arith.maximumf %7, %9 : vector<8x128xf32>
    %11 = arith.truncf %10 : vector<8x128xf32> to vector<8x128xbf16>
    %c16 = arith.constant 16 : index
    %c0_5 = arith.constant 0 : index
    %12 = vector.load %arg2[%c16, %c0_5] : memref<544x256xbf16, #tpu.memory_space<vmem>>, vector<128x128xbf16>
    %c529 = arith.constant 529 : index
    %c0_6 = arith.constant 0 : index
    %13 = vector.load %arg2[%c529, %c0_6] : memref<544x256xbf16, #tpu.memory_space<vmem>>, vector<1x128xbf16>
    %14 = arith.extf %13 : vector<1x128xbf16> to vector<1x128xf32>
    %cst_7 = arith.constant dense<0.000000e+00> : vector<8x128xf32>
    %15 = tpu.matmul %11, %12, %cst_7 {dimension_numbers = #tpu.dot_dimension_numbers<[1], [0], [0], [1], [0, 0, 1, 1], [], []>} : vector<8x128xbf16>, vector<128x128xbf16>, vector<8x128xf32> -> vector<8x128xf32>
    %16 = vector.broadcast %14 : vector<1x128xf32> to vector<8x128xf32>
    %17 = arith.addf %15, %16 : vector<8x128xf32>
    %cst_8 = arith.constant 2.000000e-01 : f32
    %18 = vector.broadcast %cst_8 : f32 to vector<8x128xf32>
    %19 = arith.mulf %18, %17 : vector<8x128xf32>
    %20 = arith.maximumf %17, %19 : vector<8x128xf32>
    %21 = arith.truncf %20 : vector<8x128xf32> to vector<8x128xbf16>
    %c144 = arith.constant 144 : index
    %c0_9 = arith.constant 0 : index
    %22 = vector.load %arg2[%c144, %c0_9] : memref<544x256xbf16, #tpu.memory_space<vmem>>, vector<128x128xbf16>
    %c530 = arith.constant 530 : index
    %c0_10 = arith.constant 0 : index
    %23 = vector.load %arg2[%c530, %c0_10] : memref<544x256xbf16, #tpu.memory_space<vmem>>, vector<1x128xbf16>
    %24 = arith.extf %23 : vector<1x128xbf16> to vector<1x128xf32>
    %cst_11 = arith.constant dense<0.000000e+00> : vector<8x128xf32>
    %25 = tpu.matmul %21, %22, %cst_11 {dimension_numbers = #tpu.dot_dimension_numbers<[1], [0], [0], [1], [0, 0, 1, 1], [], []>} : vector<8x128xbf16>, vector<128x128xbf16>, vector<8x128xf32> -> vector<8x128xf32>
    %26 = vector.broadcast %24 : vector<1x128xf32> to vector<8x128xf32>
    %27 = arith.addf %25, %26 : vector<8x128xf32>
    %cst_12 = arith.constant 2.000000e-01 : f32
    %28 = vector.broadcast %cst_12 : f32 to vector<8x128xf32>
    %29 = arith.mulf %28, %27 : vector<8x128xf32>
    %30 = arith.maximumf %27, %29 : vector<8x128xf32>
    %31 = arith.truncf %30 : vector<8x128xf32> to vector<8x128xbf16>
    %c272 = arith.constant 272 : index
    %c0_13 = arith.constant 0 : index
    %32 = vector.load %arg2[%c272, %c0_13] : memref<544x256xbf16, #tpu.memory_space<vmem>>, vector<128x128xbf16>
    %c531 = arith.constant 531 : index
    %c0_14 = arith.constant 0 : index
    %33 = vector.load %arg2[%c531, %c0_14] : memref<544x256xbf16, #tpu.memory_space<vmem>>, vector<1x128xbf16>
    %34 = arith.extf %33 : vector<1x128xbf16> to vector<1x128xf32>
    %cst_15 = arith.constant dense<0.000000e+00> : vector<8x128xf32>
    %35 = tpu.matmul %31, %32, %cst_15 {dimension_numbers = #tpu.dot_dimension_numbers<[1], [0], [0], [1], [0, 0, 1, 1], [], []>} : vector<8x128xbf16>, vector<128x128xbf16>, vector<8x128xf32> -> vector<8x128xf32>
    %36 = vector.broadcast %34 : vector<1x128xf32> to vector<8x128xf32>
    %37 = arith.addf %35, %36 : vector<8x128xf32>
    %cst_16 = arith.constant 2.000000e-01 : f32
    %38 = vector.broadcast %cst_16 : f32 to vector<8x128xf32>
    %39 = arith.mulf %38, %37 : vector<8x128xf32>
    %40 = arith.maximumf %37, %39 : vector<8x128xf32>
    %41 = arith.truncf %40 : vector<8x128xf32> to vector<8x128xbf16>
    %c400 = arith.constant 400 : index
    %c0_17 = arith.constant 0 : index
    %42 = vector.load %arg2[%c400, %c0_17] : memref<544x256xbf16, #tpu.memory_space<vmem>>, vector<128x256xbf16>
    %c532 = arith.constant 532 : index
    %c0_18 = arith.constant 0 : index
    %43 = vector.load %arg2[%c532, %c0_18] : memref<544x256xbf16, #tpu.memory_space<vmem>>, vector<1x256xbf16>
    %44 = arith.extf %43 : vector<1x256xbf16> to vector<1x256xf32>
    %cst_19 = arith.constant dense<0.000000e+00> : vector<8x256xf32>
    %45 = tpu.matmul %41, %42, %cst_19 {dimension_numbers = #tpu.dot_dimension_numbers<[1], [0], [0], [1], [0, 0, 1, 1], [], []>} : vector<8x128xbf16>, vector<128x256xbf16>, vector<8x256xf32> -> vector<8x256xf32>
    %46 = vector.broadcast %44 : vector<1x256xf32> to vector<8x256xf32>
    %47 = arith.addf %45, %46 : vector<8x256xf32>
    %cst_20 = arith.constant 0.000000e+00 : f32
    %48 = vector.broadcast %cst_20 : f32 to vector<8x256xf32>
    %49 = arith.subf %48, %47 : vector<8x256xf32>
    %50 = math.exp %49 : vector<8x256xf32>
    %cst_21 = arith.constant 1.000000e+00 : f32
    %51 = vector.broadcast %cst_21 : f32 to vector<8x256xf32>
    %52 = arith.addf %51, %50 : vector<8x256xf32>
    %53 = tpu.reciprocal %52 {approx = true} : vector<8x256xf32> -> vector<8x256xf32>
    %c0_22 = arith.constant 0 : index
    %c0_23 = arith.constant 0 : index
    %54 = vector.load %arg3[%c0_22, %c0_23] : memref<8x256xf32, #tpu.memory_space<vmem>>, vector<8x256xf32>
    tpu.vector_store %arg3[%c0_22, %c0_23], %53 {strides = array<i32>} : memref<8x256xf32, #tpu.memory_space<vmem>>, vector<8x256xf32>,
    return
  }
  func.func @transform_0(%arg0: i32) -> (i32, i32) {
    %c0_i32 = arith.constant 0 : i32
    %c0_i32_0 = arith.constant 0 : i32
    return %arg0, %c0_i32 : i32, i32
  }
  func.func @transform_1(%arg0: i32) -> (i32, i32) {
    %c0_i32 = arith.constant 0 : i32
    %c0_i32_0 = arith.constant 0 : i32
    %c0_i32_1 = arith.constant 0 : i32
    return %c0_i32, %c0_i32_0 : i32, i32
  }
  func.func @transform_2(%arg0: i32) -> (i32, i32) {
    %c0_i32 = arith.constant 0 : i32
    %c0_i32_0 = arith.constant 0 : i32
    return %arg0, %c0_i32 : i32, i32
  }
}

</mosaic_0001>

<bundles_post_ra>
// kernel: tpu_custom_call.1
= control target key start
LH: loop header
LB: loop body
LE: loop exit
PB: predicated region body
PF: predicated region fallthrough
CT: control target
= control target key end

     0   :  { %7 = vsyncpa [#allocation3], 0  ;;  %s953_s0 = inlined_call_operand.hbm [shape: f32[8,16], index: 0, kind: input, shape index: {}]   ;;  %s954_s1 = inlined_call_operand.hbm [shape: bf16[544,256], index: 1, kind: input, shape index: {}]   ;;  %s955_s2 = inlined_call_operand.hbm [shape: f32[8,256], index: 2, kind: output, shape index: {}]  }
   0x1   :  { %8 = vsyncpa [#allocation6], 0 }
   0x2   :  { %9 = vsyncpa [#allocation4], 0  ;;  %s881_s9 = smov [#allocation2]   ;;  %s882_s11 = smov [#allocation5]  }
   0x3   :  { %s16_s10 = sshll.u32 %s881_s9, 4  ;;  %s25_s12 = sshll.u32 %s882_s11, 4  ;;  %s17_s10 = int_to_ptr.vmem [resolvable:$true] %s16_s10  ;;  %s26_s12 = int_to_ptr.vmem [resolvable:$true] %s25_s12 }
   0x4   :  { %s823_s13 = scalar_lea.vmem %s17_s10, 128  ;;  %p828_p1 = scmp.lt.s32.totalorder %s17_s10, %s17_s10 }
   0x5   :  { %p824_p0 = scmp.ne.s32.totalorder %s17_s10, %s823_s13  ;;  %p829_p2 = scmp.lt.s32.totalorder %s823_s13, %s823_s13 }
   0x7   :  { %p830_p3 = por %p829_p2, %p828_p1 }
   0x9   :  { %p831_p4 = pnand %p830_p3, %p824_p0 }
   0xb   :  { %834 = shalt.err (!%p831_p4)
}
   0xc   :  { %19 = dma.hbm_to_vmem [thread:$0]  %s953_s0, 128, %s17_s10, [#allocation3]  }
   0xd   :  { %s843_s16 = scalar_lea.vmem %s26_s12, 8704  ;;  %p848_p6 = scmp.lt.s32.totalorder %s26_s12, %s26_s12 }
   0xe   :  { %p844_p5 = scmp.ne.s32.totalorder %s26_s12, %s843_s16  ;;  %p849_p7 = scmp.lt.s32.totalorder %s843_s16, %s843_s16 }
  0x10   :  { %p850_p8 = por %p849_p7, %p848_p6 }
  0x12   :  { %p851_p9 = pnand %p850_p8, %p844_p5 }
  0x14   :  { %854 = shalt.err (!%p851_p9)
}
  0x15   :  { %s883_s17 = smov 128   ;;  %s884_s18 = smov 8  }
  0x16   :  { %31 = dma.hbm_to_vmem [thread:$0]  %s954_s1, 8704, %s26_s12, [#allocation6], %s883_s17, %s883_s17, %s884_s18  }
  0x17   :  { %875 = dma.done.wait [#allocation3], 128  }
  0x18   :  { %876 = vsyncadd [#allocation3], 4294967168 }
  0x19   :  { %877 = dma.done.wait [#allocation6], 8704  }
  0x1a   :  { %878 = vsyncadd [#allocation6], 4294958592  ;;  %v885_v0 = vmov 0.0   ;;  %vm886_vm0 = vmmov 0   ;;  %v758_v1 = vld [vmem:[#allocation5] ss:$8 sps:$4 sm:$0xff]   ;;  %v45_v18 = vlaneseq }
  0x1b   :  { %684 = vmatprep.subr.bf16.mxu0 %v885_v0  ;;  %686 = vmatprep.mubr.msk.bf16.mxu0 %vm886_vm0, %v885_v0  ;;  %v39_v2 = vld [vmem:[#allocation2] sm:$0xff]  ;;  %vm55_vm1 = vcmask 130048   ;;  %v759_v4 = vld [vmem:[#allocation5 + $0x80] ss:$8 sps:$4 sm:$0xff]   ;;  %v43_v20 = vld [vmem:[#allocation5 + $0x210] sm:$0x1] }
  0x1c   :  { %690 = vmatprep.subr.bf16.mxu1 %v885_v0  ;;  %706 = vmatprep.mubr.msk.bf16.mxu1 %vm886_vm0, %v885_v0  ;;  %v40_v3 = vpack.c.bf16 %v39_v2, %v39_v2  ;;  %v760_v5 = vld [vmem:[#allocation5 + $0x70] ss:$8 sps:$4 sm:$0xff]   ;;  %v761_v6 = vld [vmem:[#allocation5 + $0x60] ss:$8 sps:$4 sm:$0xff]   ;;  %v933_v19 = vshrl.u32 %v45_v18, 7  ;;  %v44_v21 = vunpack.c.l.bf16 %v43_v20  ;;  %s888_s0 = smov [#allocation7]  }
  0x1d   :  { %685 = vmatpush3.bf16.msra.mxu0 %v758_v1  ;;  %691 = vmatpush3.bf16.msra.mxu1 %v759_v4  ;;  %v762_v7 = vld [vmem:[#allocation5 + $0x50] ss:$8 sps:$4 sm:$0xff]   ;;  %v763_v8 = vld [vmem:[#allocation5 + $0x40] ss:$8 sps:$4 sm:$0xff]   ;;  %v785_v53 = vld [vmem:[#allocation5 + $0x204] ss:$8 sps:$4 sm:$0xff]  }
  0x1e   :  { %710 = vmatprep.subr.bf16.mxu0 %v885_v0  ;;  %692 = vmatprep.subr.bf16.mxu1 %v885_v0  ;;  %v764_v9 = vld [vmem:[#allocation5 + $0x30] ss:$8 sps:$4 sm:$0xff]   ;;  %v765_v10 = vld [vmem:[#allocation5 + $0x20] ss:$8 sps:$4 sm:$0xff]   ;;  %v47_v22 = vsub.s32 0, %v933_v19  ;;  %v120_v40 = vsub.s32 1, %v933_v19 }
  0x1f   :  { %v766_v11 = vld [vmem:[#allocation5 + $0x10] ss:$8 sps:$4 sm:$0xff]   ;;  %v767_v12 = vld [vmem:[#allocation5 + $0x100] ss:$8 sps:$4 sm:$0xff]   ;;  %v788_v54 = vld [vmem:[#allocation5 + $0x1f4] ss:$8 sps:$4 sm:$0xff]  }
  0x20   :  { %687 = vmatmul.mubr.msk.bf16.vlgmr.msra.gmra.mxu0 %vm55_vm1, %v40_v3  ;;  %v768_v13 = vld [vmem:[#allocation5 + $0xf0] ss:$8 sps:$4 sm:$0xff]   ;;  %v769_v14 = vld [vmem:[#allocation5 + $0xe0] ss:$8 sps:$4 sm:$0xff]   ;;  %v48_v23 = vrot.slane %v44_v21, %v47_v22  ;;  %v121_v41 = vrot.slane %v44_v21, %v120_v40  ;;  %v791_v56 = vld [vmem:[#allocation5 + $0x1e4] ss:$8 sps:$4 sm:$0xff]  }
  0x21   :  { %726 = vmatprep.mubr.msk.bf16.mxu0 %vm886_vm0, %v885_v0  ;;  %693 = vmatpush3.bf16.msra.mxu1 %v760_v5  ;;  %v770_v15 = vld [vmem:[#allocation5 + $0xd0] ss:$8 sps:$4 sm:$0xff]   ;;  %v771_v16 = vld [vmem:[#allocation5 + $0xc0] ss:$8 sps:$4 sm:$0xff]   ;;  %v794_v58 = vld [vmem:[#allocation5 + $0x1d4] ss:$8 sps:$4 sm:$0xff]  }
  0x22   :  { %694 = vmatprep.subr.bf16.mxu1 %v885_v0  ;;  %711 = vmatpush3.bf16.msra.mxu0 %v767_v12  ;;  %v772_v17 = vld [vmem:[#allocation5 + $0xb0] ss:$8 sps:$4 sm:$0xff]   ;;  %v773_v32 = vld [vmem:[#allocation5 + $0xa0] ss:$8 sps:$4 sm:$0xff]   ;;  %v797_v60 = vld [vmem:[#allocation5 + $0x1c4] ss:$8 sps:$4 sm:$0xff]  }
  0x23   :  { %712 = vmatprep.subr.bf16.mxu0 %v885_v0  ;;  %v774_v33 = vld [vmem:[#allocation5 + $0x90] ss:$8 sps:$4 sm:$0xff]   ;;  %v775_v34 = vld [vmem:[#allocation5 + $0x180] ss:$8 sps:$4 sm:$0xff]   ;;  %v800_v62 = vld [vmem:[#allocation5 + $0x1b4] ss:$8 sps:$4 sm:$0xff]  }
  0x24   :  { %v776_v35 = vld [vmem:[#allocation5 + $0x170] ss:$8 sps:$4 sm:$0xff]   ;;  %v777_v36 = vld [vmem:[#allocation5 + $0x160] ss:$8 sps:$4 sm:$0xff]   ;;  %v233_v2 = vsub.s32 2, %v933_v19  ;;  %s603_s1 = sshll.u32 %s888_s0, 4  ;;  %s604_s1 = int_to_ptr.vmem [resolvable:$true] %s603_s1 }
  0x25   :  { %695 = vmatpush3.bf16.msra.mxu1 %v761_v6  ;;  %v778_v37 = vld [vmem:[#allocation5 + $0x150] ss:$8 sps:$4 sm:$0xff]   ;;  %v779_v38 = vld [vmem:[#allocation5 + $0x140] ss:$8 sps:$4 sm:$0xff]   ;;  %v803_v12 = vld [vmem:[#allocation5 + $0x1a4] ss:$8 sps:$4 sm:$0xff]   ;;  %p860_p11 = scmp.lt.s32.totalorder %s604_s1, %s604_s1 }
  0x26   :  { %696 = vmatprep.subr.bf16.mxu1 %v885_v0  ;;  %713 = vmatpush3.bf16.msra.mxu0 %v768_v13  ;;  %v780_v39 = vld [vmem:[#allocation5 + $0x130] ss:$8 sps:$4 sm:$0xff]   ;;  %v781_v50 = vld [vmem:[#allocation5 + $0x120] ss:$8 sps:$4 sm:$0xff]   ;;  %s855_s21 = scalar_lea.vmem %s604_s1, 256 }
  0x27   :  { %714 = vmatprep.subr.bf16.mxu0 %v885_v0  ;;  %v782_v51 = vld [vmem:[#allocation5 + $0x110] ss:$8 sps:$4 sm:$0xff]   ;;  %v783_v52 = vld [vmem:[#allocation5 + $0x200] ss:$8 sps:$4 sm:$0xff]   ;;  %p856_p10 = scmp.ne.s32.totalorder %s604_s1, %s855_s21  ;;  %p861_p12 = scmp.lt.s32.totalorder %s855_s21, %s855_s21 }
  0x28   :  { %v786_v55 = vld [vmem:[#allocation5 + $0x1f0] ss:$8 sps:$4 sm:$0xff]   ;;  %v789_v57 = vld [vmem:[#allocation5 + $0x1e0] ss:$8 sps:$4 sm:$0xff]  }
  0x29   :  { %697 = vmatpush3.bf16.msra.mxu1 %v762_v7  ;;  %v792_v59 = vld [vmem:[#allocation5 + $0x1d0] ss:$8 sps:$4 sm:$0xff]   ;;  %v795_v61 = vld [vmem:[#allocation5 + $0x1c0] ss:$8 sps:$4 sm:$0xff]   ;;  %p862_p13 = por %p861_p12, %p860_p11 }
  0x2a   :  { %698 = vmatprep.subr.bf16.mxu1 %v885_v0  ;;  %715 = vmatpush3.bf16.msra.mxu0 %v769_v14  ;;  %v798_v63 = vld [vmem:[#allocation5 + $0x1b0] ss:$8 sps:$4 sm:$0xff]   ;;  %v801_v13 = vld [vmem:[#allocation5 + $0x1a0] ss:$8 sps:$4 sm:$0xff]   ;;  %v806_v14 = vld [vmem:[#allocation5 + $0x194] ss:$8 sps:$4 sm:$0xff]  }
  0x2b   :  { %716 = vmatprep.subr.bf16.mxu0 %v885_v0  ;;  %p863_p0 = pnand %p862_p13, %p856_p10 }
  0x2d   :  { %699 = vmatpush3.bf16.msra.mxu1 %v763_v8 }
  0x2e   :  { %700 = vmatprep.subr.bf16.mxu1 %v885_v0  ;;  %717 = vmatpush3.bf16.msra.mxu0 %v770_v15  ;;  %v804_v15 = vld [vmem:[#allocation5 + $0x190] ss:$8 sps:$4 sm:$0xff]  }
  0x2f   :  { %718 = vmatprep.subr.bf16.mxu0 %v885_v0 }
  0x31   :  { %701 = vmatpush3.bf16.msra.mxu1 %v764_v9 }
  0x32   :  { %702 = vmatprep.subr.bf16.mxu1 %v885_v0  ;;  %719 = vmatpush3.bf16.msra.mxu0 %v771_v16  ;;  %v887_v16 = vmov 0  }
  0x33   :  { %720 = vmatprep.subr.bf16.mxu0 %v885_v0 }
  0x35   :  { %703 = vmatpush3.bf16.msra.mxu1 %v765_v10 }
  0x36   :  { %704 = vmatprep.subr.bf16.mxu1 %v885_v0  ;;  %721 = vmatpush3.bf16.msra.mxu0 %v772_v17  ;;  %v344_v17 = vsub.s32 3, %v933_v19 }
  0x37   :  { %722 = vmatprep.subr.bf16.mxu0 %v885_v0 }
  0x39   :  { %705 = vmatpush3.bf16.msra.mxu1 %v766_v11 }
  0x3a   :  { %730 = vmatprep.subr.bf16.mxu1 %v885_v0  ;;  %723 = vmatpush3.bf16.msra.mxu0 %v773_v32 }
  0x3b   :  { %724 = vmatprep.subr.bf16.mxu0 %v885_v0 }
  0x3e   :  { %725 = vmatpush3.bf16.msra.mxu0 %v774_v33 }
  0x3f   :  { %544 = vmatprep.subr.bf16.mxu0 %v785_v53 }
  0xe0   :  { %v93_v24 = vpop.f32.mrf.mxu0 }
  0xe1   :  { %v94_v25 = vadd.f32 %v93_v24, %v48_v23 }
  0xe2   :  { %v688_v26 = vpop.f32.mrf.mxu0 }
  0xe3   :  { %v99_v27 = vmul.f32 0.2, %v94_v25 }
  0xe4   :  { %v96_v28 = vpop.f32.mrf.mxu0 }
  0xe5   :  { %v100_v29 = vmax.f32 %v94_v25, %v99_v27  ;;  %v453_v28 = vld [vmem:[#allocation5 + $0x210] sm:$0x44] }
  0xe6   :  { %v689_v30 = vpop.f32.mrf.mxu0 }
  0xe7   :  { %v101_v31 = vpack.c.bf16 %v100_v29, %v100_v29  ;;  %v454_v29 = vunpack.c.l.bf16 %v453_v28  ;;  %v458_v30 = vsub.s32 4, %v933_v19 }
  0xe9   :  { %707 = vmatmul.mubr.bf16.vlgmr.msra.gmra.mxu1 %v101_v31  ;;  %v455_v31 = vunpack.c.h.bf16 %v453_v28  ;;  %v459_v32 = vrot.slane %v454_v29, %v458_v30 }
  0xea   :  { %746 = vmatprep.mubr.msk.bf16.mxu1 %vm886_vm0, %v885_v0  ;;  %731 = vmatpush3.bf16.msra.mxu1 %v775_v34 }
  0xeb   :  { %732 = vmatprep.subr.bf16.mxu1 %v885_v0  ;;  %v463_v33 = vrot.slane %v455_v31, %v458_v30 }
  0xee   :  { %733 = vmatpush3.bf16.msra.mxu1 %v776_v35 }
  0xef   :  { %734 = vmatprep.subr.bf16.mxu1 %v885_v0 }
  0xf2   :  { %735 = vmatpush3.bf16.msra.mxu1 %v777_v36 }
  0xf3   :  { %736 = vmatprep.subr.bf16.mxu1 %v885_v0 }
  0xf6   :  { %737 = vmatpush3.bf16.msra.mxu1 %v778_v37 }
  0xf7   :  { %738 = vmatprep.subr.bf16.mxu1 %v885_v0 }
  0xfa   :  { %739 = vmatpush3.bf16.msra.mxu1 %v779_v38 }
  0xfb   :  { %740 = vmatprep.subr.bf16.mxu1 %v885_v0 }
  0xfe   :  { %741 = vmatpush3.bf16.msra.mxu1 %v780_v39 }
  0xff   :  { %742 = vmatprep.subr.bf16.mxu1 %v885_v0 }
 0x102   :  { %743 = vmatpush3.bf16.msra.mxu1 %v781_v50 }
 0x103   :  { %744 = vmatprep.subr.bf16.mxu1 %v885_v0  ;;  %v229_v0 = vld [vmem:[#allocation5 + $0x210] sm:$0x2] }
 0x104   :  { %v230_v1 = vunpack.c.l.bf16 %v229_v0 }
 0x106   :  { %745 = vmatpush3.bf16.msra.mxu1 %v782_v51  ;;  %v234_v3 = vrot.slane %v230_v1, %v233_v2  ;;  %v345_v18 = vrot.slane %v230_v1, %v344_v17 }
 0x1a9   :  { %v204_v42 = vpop.f32.mrf.mxu1 }
 0x1aa   :  { %v205_v43 = vadd.f32 %v204_v42, %v121_v41 }
 0x1ab   :  { %v708_v44 = vpop.f32.mrf.mxu1 }
 0x1ac   :  { %v210_v45 = vmul.f32 0.2, %v205_v43 }
 0x1ad   :  { %v207_v46 = vpop.f32.mrf.mxu1 }
 0x1ae   :  { %v211_v47 = vmax.f32 %v205_v43, %v210_v45 }
 0x1af   :  { %v709_v48 = vpop.f32.mrf.mxu1 }
 0x1b0   :  { %v212_v49 = vpack.c.bf16 %v211_v47, %v211_v47 }
 0x1b2   :  { %727 = vmatmul.mubr.bf16.vlgmr.msra.gmra.mxu0 %v212_v49 }
 0x1b3   :  { %545 = vmatpush1.bf16.msra.mxu0 %v783_v52  ;;  %576 = vmatprep.mubr.bf16.mxu0 %v887_v16 }
 0x1b4   :  { %546 = vmatprep.subr.bf16.mxu0 %v788_v54 }
 0x1b7   :  { %547 = vmatpush1.bf16.msra.mxu0 %v786_v55 }
 0x1b8   :  { %548 = vmatprep.subr.bf16.mxu0 %v791_v56 }
 0x1bb   :  { %549 = vmatpush1.bf16.msra.mxu0 %v789_v57 }
 0x1bc   :  { %550 = vmatprep.subr.bf16.mxu0 %v794_v58 }
 0x1bf   :  { %551 = vmatpush1.bf16.msra.mxu0 %v792_v59 }
 0x1c0   :  { %552 = vmatprep.subr.bf16.mxu0 %v797_v60 }
 0x1c3   :  { %553 = vmatpush1.bf16.msra.mxu0 %v795_v61 }
 0x1c4   :  { %554 = vmatprep.subr.bf16.mxu0 %v800_v62 }
 0x1c7   :  { %555 = vmatpush1.bf16.msra.mxu0 %v798_v63 }
 0x1c8   :  { %556 = vmatprep.subr.bf16.mxu0 %v803_v12 }
 0x1cb   :  { %557 = vmatpush1.bf16.msra.mxu0 %v801_v13 }
 0x1cc   :  { %558 = vmatprep.subr.bf16.mxu0 %v806_v14 }
 0x1cf   :  { %559 = vmatpush1.bf16.msra.mxu0 %v804_v15 }
 0x272   :  { %v317_v4 = vpop.f32.mrf.mxu0 }
 0x273   :  { %v318_v5 = vadd.f32 %v317_v4, %v234_v3 }
 0x274   :  { %v728_v6 = vpop.f32.mrf.mxu0 }
 0x275   :  { %v323_v7 = vmul.f32 0.2, %v318_v5 }
 0x276   :  { %v320_v8 = vpop.f32.mrf.mxu0 }
 0x277   :  { %v324_v9 = vmax.f32 %v318_v5, %v323_v7 }
 0x278   :  { %v729_v10 = vpop.f32.mrf.mxu0 }
 0x279   :  { %v325_v11 = vpack.c.bf16 %v324_v9, %v324_v9 }
 0x27b   :  { %747 = vmatmul.mubr.bf16.vlgmr.msra.gmra.mxu1 %v325_v11 }
 0x33b   :  { %v428_v20 = vpop.f32.mrf.mxu1 }
 0x33c   :  { %v429_v21 = vadd.f32 %v428_v20, %v345_v18 }
 0x33d   :  { %v748_v22 = vpop.f32.mrf.mxu1 }
 0x33e   :  { %v434_v23 = vmul.f32 0.2, %v429_v21 }
 0x33f   :  { %v431_v24 = vpop.f32.mrf.mxu1 }
 0x340   :  { %v435_v25 = vmax.f32 %v429_v21, %v434_v23 }
 0x341   :  { %v749_v26 = vpop.f32.mrf.mxu1 }
 0x342   :  { %v436_v27 = vpack.c.bf16 %v435_v25, %v435_v25 }
 0x344   :  { %577 = vmatmul.mubr.bf16.vlgmr.msra.gmra.mxu0 %v436_v27 }
 0x404   :  { %v578_v34 = vpop.f32.mrf.mxu0 }
 0x405   :  { %v579_v35 = vadd.f32 %v578_v34, %v459_v32 }
 0x406   :  { %v580_v36 = vpop.f32.mrf.mxu0 }
 0x407   :  { %v585_v37 = vsub.f32 0.0, %v579_v35  ;;  %v581_v38 = vadd.f32 %v580_v36, %v463_v33 }
 0x408   :  { %v582_v39 = vpop.f32.mrf.mxu0 }
 0x409   :  { %v587_v40 = vmul.f32 1.442695, %v585_v37  ;;  %v586_v41 = vsub.f32 0.0, %v581_v38 }
 0x40a   :  { %v583_v42 = vpop.f32.mrf.mxu0 }
 0x40b   :  { %807 = vpow2.f32 %v587_v40  ;;  %v589_v43 = vmul.f32 1.442695, %v586_v41 }
 0x40d   :  { %809 = vpow2.f32 %v589_v43 }
 0x418   :  { %v808_v44 = vpop.eup %807 }
 0x419   :  { %v591_v45 = vadd.f32 1.0, %v808_v44 }
 0x41a   :  { %v810_v46 = vpop.eup %809 }
 0x41b   :  { %811 = vrcp.f32 %v591_v45  ;;  %v592_v19 = vadd.f32 1.0, %v810_v46 }
 0x41d   :  { %813 = vrcp.f32 %v592_v19 }
 0x428   :  { %v812_v47 = vpop.eup %811 }
 0x429   :  { %595 = vst [vmem:[#allocation7] sm:$0xff] %v812_v47 }
 0x42a   :  { %v814_v48 = vpop.eup %813 }
 0x42b   :  { %596 = vst [vmem:[#allocation7 + $0x8] sm:$0xff] %v814_v48 }
 0x42c   :  { %866 = shalt.err (!%p863_p0)
}
 0x42d   :  { %606 = dma.vmem_to_hbm [thread:$0]  %s604_s1, 256, %s955_s2, [#allocation4]  }
 0x42e   :  { %879 = dma.done.wait [#allocation4], 256  }
 0x42f   :  { %880 = vsyncadd [#allocation4], 4294967040 }
 0x430   :  { %610 = vsyncpa [#allocation3], 1 }
 0x431   :  { %611 = vsyncpa [#allocation6], 1 }
 0x432   :  { %612 = vsyncpa [#allocation4], 1 }

</bundles_post_ra>
